<compile_context>
chip_gen: v7x
topology: tpu7x:2x2x1
jax: 0.10.0
libtpu: 0.0.40
codegen_flags: <defaults>
</compile_context>

<pallas_src>
import jax
import jax.numpy as jnp
from jax.experimental import pallas as pl
from jax.experimental.pallas import tpu as pltpu

_LANE = 128
_SUBLANE = 8
_F32 = 4  # bytes per element


def _ceil_div(a, b):
    return -(-a // b)


def _round_up(a, m):
    return _ceil_div(a, m) * m


# ----------------------------------------------------------------------------
# Kernel body
# ----------------------------------------------------------------------------
def _self_attn_pool_kernel(x_ref, mask_ref, w1_ref, b1_ref, w2_ref, out_ref):
    # x_ref:    (Bt, Sp, E)  one batch block, Sp = S padded to a multiple of 8
    # mask_ref: (Bt, Sp)     additive mask (0 valid / -1e9 masked or padded)
    # w1_ref:   (E, H)       b1_ref: (1, H)
    # w2_ref:   (1, H)       second Linear's weight as a row vector
    # out_ref:  (Bt, E)      pooled output block
    Bt, Sp, E = x_ref.shape
    H = w1_ref.shape[1]

    x = x_ref[...]                                                      # (Bt, Sp, E)

    # --- score MLP: Linear(E,H) -> ReLU as ONE 2-D MXU matmul over Bt*Sp rows.
    # Sp is a multiple of 8 (sublane), so these reshapes are tile-aligned and
    # layout-preserving (no relayout copies).
    h = jnp.dot(x.reshape(Bt * Sp, E), w1_ref[...],
                preferred_element_type=jnp.float32) + b1_ref[...]       # (Bt*Sp, H)
    h = jnp.maximum(h, 0.0)

    # --- Linear(H,1) as a VPU multiply + lane reduce (an N=1 MXU matmul would
    # waste the systolic array).  b2 is constant along the softmax axis and is
    # therefore softmax-invariant -> dropped.
    s = jnp.sum(h.reshape(Bt, Sp, H) * w2_ref[...], axis=-1)            # (Bt, Sp)

    # --- softmax over the sequence axis (torch dim=1)
    s = s + mask_ref[...]                                               # (Bt, Sp)
    m = jnp.max(s, axis=-1, keepdims=True)
    e = jnp.exp(s - m)
    w = e * pl.reciprocal(jnp.sum(e, axis=-1, keepdims=True), approx=False)

    # --- weighted pooling: out[b, :] = sum_s x[b, s, :] * w[b, s]
    out_ref[...] = jnp.sum(x * w[:, :, None], axis=1).astype(out_ref.dtype)


# ----------------------------------------------------------------------------
# Block-size selection (byte-based, generation-aware)
# ----------------------------------------------------------------------------
def _tpu_vmem_and_cores():
    """(physical per-core VMEM bytes, TensorCores per chip) with safe fallbacks."""
    vmem_bytes = 64 * 1024 * 1024            # conservative: smallest current (v7x)
    try:
        vmem_bytes = int(pltpu.get_tpu_info().vmem_capacity_bytes)
    except Exception:
        pass
    num_cores = 1
    try:
        kind = jax.devices()[0].device_kind.lower()
        # chips whose Pallas grid is sharded across 2 TensorCores
        if ("v7" in kind) or ("v4" in kind) or ("v5p" in kind):
            num_cores = 2
    except Exception:
        pass
    return vmem_bytes, num_cores


def _block_vmem_bytes(bt, sp, E, H):
    """Padded-layout VMEM footprint of one grid step with batch block `bt`.

    Minor dim pads to 128 lanes, second-minor to 8 sublanes.  Counts the
    double-buffered pipelined blocks (x, mask, out), the resident parameters,
    and the in-kernel live intermediates (x value, hidden activations,
    score/exp/weight rows, pooled result).
    """
    ep = _round_up(E, _LANE)
    hp = _round_up(H, _LANE)
    sl = _round_up(sp, _LANE)
    btp = _round_up(bt, _SUBLANE)
    x_blk = bt * sp * ep * _F32              # sp already a multiple of 8
    mask_blk = btp * sl * _F32
    out_blk = btp * ep * _F32
    pipelined = 2 * (x_blk + mask_blk + out_blk)                 # double-buffered
    params = 2 * (_round_up(E, _SUBLANE) * hp + 2 * _SUBLANE * hp) * _F32
    live = (bt * sp * ep                      # x value
            + bt * sp * hp                    # hidden activations
            + 3 * btp * sl                    # score / exp / softmax weight
            + btp * ep) * _F32                # pooled
    return pipelined + params + live


def _pick_block_batch(B, sp, E, H, vmem_budget_bytes, num_cores):
    """Largest batch block (multiple of 8 rows) whose grid step fits the budget.

    On 1-TC chips the whole padded batch is one block when it fits (grid=(1,)).
    On 2-TC chips the block is capped at ceil(B/2) so both cores get work.
    """
    target = _round_up(max(B, 1), _SUBLANE)
    if num_cores >= 2 and target > _SUBLANE:
        target = _round_up(_ceil_div(B, num_cores), _SUBLANE)    # >= 2 grid steps
    if _block_vmem_bytes(target, sp, E, H) <= vmem_budget_bytes:
        return target
    lo, hi = 1, max(1, target // _SUBLANE)   # binary search in units of 8 rows
    while lo < hi:
        mid = (lo + hi + 1) // 2
        if _block_vmem_bytes(mid * _SUBLANE, sp, E, H) <= vmem_budget_bytes:
            lo = mid
        else:
            hi = mid - 1
    return max(_SUBLANE, lo * _SUBLANE)


# ----------------------------------------------------------------------------
# Wrapper
# ----------------------------------------------------------------------------
def self_attn_pooling(x, mask, w1, b1, w2, b2=None):
    """x: (B, S, E) f32, mask: (B, S) f32 additive mask. Returns (B, E).

    b2 (final Linear bias) is accepted for interface parity but unused: it is
    constant along the softmax (sequence) axis, hence softmax-invariant.
    """
    B, S, E = x.shape
    H = w1.shape[1]

    # Pad S to a sublane multiple so in-kernel folds are tile-aligned.
    sp = _round_up(S, _SUBLANE)
    if sp != S:
        x = jnp.pad(x, ((0, 0), (0, sp - S), (0, 0)))
        mask = jnp.pad(mask, ((0, 0), (0, sp - S)), constant_values=-1e9)

    vmem_physical, num_cores = _tpu_vmem_and_cores()
    # Generation-aware scoped-VMEM limit: ~96 MiB on v5e/v6e, ~48 MiB on v7x.
    vmem_limit = min(vmem_physical * 3 // 4, vmem_physical - 16 * 1024 * 1024)
    vmem_limit = max(vmem_limit, min(vmem_physical, 32 * 1024 * 1024))
    reserve = 2 * 1024 * 1024                # Mosaic internal scratch headroom

    Bt = _pick_block_batch(B, sp, E, H, vmem_limit - reserve, num_cores)
    # Never request less than the chosen block actually needs (capped at physical).
    vmem_limit = min(vmem_physical,
                     max(vmem_limit, _block_vmem_bytes(Bt, sp, E, H) + reserve))

    B_pad = _round_up(B, Bt)
    if B_pad != B:
        # zero-padded rows have finite scores (mask=0) and pool to 0; sliced off
        x = jnp.pad(x, ((0, B_pad - B), (0, 0), (0, 0)))
        mask = jnp.pad(mask, ((0, B_pad - B), (0, 0)))

    b1_row = b1.reshape(1, H)
    w2_row = w2.reshape(1, H)   # (H, 1) -> (1, H)

    out = pl.pallas_call(
        _self_attn_pool_kernel,
        out_shape=jax.ShapeDtypeStruct((B_pad, E), x.dtype),
        grid_spec=pltpu.PrefetchScalarGridSpec(
            num_scalar_prefetch=0,
            grid=(B_pad // Bt,),
            in_specs=[
                pl.BlockSpec((Bt, sp, E), lambda b: (b, 0, 0)),  # x block
                pl.BlockSpec((Bt, sp), lambda b: (b, 0)),        # mask, 2-D
                pl.BlockSpec((E, H), lambda b: (0, 0)),          # w1 (resident)
                pl.BlockSpec((1, H), lambda b: (0, 0)),          # b1
                pl.BlockSpec((1, H), lambda b: (0, 0)),          # w2 row
            ],
            out_specs=pl.BlockSpec((Bt, E), lambda b: (b, 0)),
        ),
        compiler_params=pltpu.CompilerParams(
            dimension_semantics=("parallel",),
            vmem_limit_bytes=int(vmem_limit),
        ),
    )(x, mask, w1, b1_row, w2_row)
    return out[:B]


# ----------------------------------------------------------------------------
# Reference + test
# ----------------------------------------------------------------------------
def _reference(x, mask, w1, b1, w2, b2):
    h = jnp.maximum(jnp.einsum("bse,eh->bsh", x, w1) + b1, 0.0)
    s = jnp.einsum("bsh,ho->bso", h, w2) + b2            # (B, S, 1)
    s = s + mask[:, :, None]
    w = jax.nn.softmax(s, axis=1)                        # (B, S, 1)
    return jnp.sum(x * w, axis=1)                        # (B, E)


if __name__ == "__main__":
    B, S, E, H = 16, 8, 32, 32
    key = jax.random.PRNGKey(0)
    k_x, k_w1, k_b1, k_w2, k_b2 = jax.random.split(key, 5)

    x = jax.random.normal(k_x, (B, S, E), dtype=jnp.float32)
    # additive mask: 0 where valid, -1e9 where masked
    mask = jnp.zeros((B, S), dtype=jnp.float32)
    mask = mask.at[1, S - 2:].set(-1e9)
    mask = mask.at[5, S - 5:].set(-1e9)

    # deterministic parameter init (shapes from nn.Linear(E,32) and nn.Linear(32,1))
    w1 = jax.random.normal(k_w1, (E, H), dtype=jnp.float32) * 0.1
    b1 = jax.random.normal(k_b1, (H,), dtype=jnp.float32) * 0.1
    w2 = jax.random.normal(k_w2, (H, 1), dtype=jnp.float32) * 0.1
    b2 = jax.random.normal(k_b2, (1,), dtype=jnp.float32) * 0.1

    out = self_attn_pooling(x, mask, w1, b1, w2, b2)
    out = jax.block_until_ready(out)

    ref = _reference(x, mask, w1, b1, w2, b2)
    assert out.shape == (B, E)
    assert jnp.allclose(out, ref, atol=1e-5, rtol=1e-5), "mismatch vs reference"
    print("KERNEL_OK")
</pallas_src>

<mosaic_0001>
module attributes {stable_mosaic.version = 11 : i64} {
  func.func @_self_attn_pool_kernel(%arg0: i32, %arg1: memref<16x8x32xf32, #tpu.memory_space<vmem>>, %arg2: memref<16x8xf32, #tpu.memory_space<vmem>>, %arg3: memref<32x32xf32, #tpu.memory_space<vmem>>, %arg4: memref<1x32xf32, #tpu.memory_space<vmem>>, %arg5: memref<1x32xf32, #tpu.memory_space<vmem>>, %arg6: memref<16x32xf32, #tpu.memory_space<vmem>>) attributes {dimension_semantics = [#tpu.dimension_semantics<parallel>], iteration_bounds = array<i64: 1>, scalar_prefetch = 0 : i64, scratch_operands = 0 : i64, tpu.core_type = #tpu.core_type<tc>, window_params = [{transform_indices = @transform_0, window_bounds = array<i64: 16, 8, 32>}, {transform_indices = @transform_1, window_bounds = array<i64: 16, 8>}, {pipeline_mode = #tpu.pipeline_mode<synchronous>, transform_indices = @transform_2, window_bounds = array<i64: 32, 32>}, {pipeline_mode = #tpu.pipeline_mode<synchronous>, transform_indices = @transform_3, window_bounds = array<i64: 1, 32>}, {pipeline_mode = #tpu.pipeline_mode<synchronous>, transform_indices = @transform_4, window_bounds = array<i64: 1, 32>}, {transform_indices = @transform_5, window_bounds = array<i64: 16, 32>}]} {
    %c0 = arith.constant 0 : index
    %c0_0 = arith.constant 0 : index
    %c0_1 = arith.constant 0 : index
    %0 = vector.load %arg1[%c0, %c0_0, %c0_1] : memref<16x8x32xf32, #tpu.memory_space<vmem>>, vector<16x8x32xf32>
    %1 = vector.shape_cast %0 : vector<16x8x32xf32> to vector<128x32xf32>
    %c0_2 = arith.constant 0 : index
    %c0_3 = arith.constant 0 : index
    %2 = vector.load %arg3[%c0_2, %c0_3] : memref<32x32xf32, #tpu.memory_space<vmem>>, vector<32x32xf32>
    %cst = arith.constant dense<0.000000e+00> : vector<128x32xf32>
    %3 = tpu.matmul %1, %2, %cst {dimension_numbers = #tpu.dot_dimension_numbers<[1], [0], [0], [1], [0, 0, 1, 1], [], []>} : vector<128x32xf32>, vector<32x32xf32>, vector<128x32xf32> -> vector<128x32xf32>
    %c0_4 = arith.constant 0 : index
    %c0_5 = arith.constant 0 : index
    %4 = vector.load %arg4[%c0_4, %c0_5] : memref<1x32xf32, #tpu.memory_space<vmem>>, vector<1x32xf32>
    %5 = vector.broadcast %4 : vector<1x32xf32> to vector<128x32xf32>
    %6 = arith.addf %3, %5 : vector<128x32xf32>
    %cst_6 = arith.constant 0.000000e+00 : f32
    %7 = vector.broadcast %cst_6 : f32 to vector<128x32xf32>
    %8 = arith.maximumf %6, %7 : vector<128x32xf32>
    %9 = vector.shape_cast %8 : vector<128x32xf32> to vector<16x8x32xf32>
    %c0_7 = arith.constant 0 : index
    %c0_8 = arith.constant 0 : index
    %10 = vector.load %arg5[%c0_7, %c0_8] : memref<1x32xf32, #tpu.memory_space<vmem>>, vector<1x32xf32>
    %11 = vector.shape_cast %10 : vector<1x32xf32> to vector<1x1x32xf32>
    %12 = vector.broadcast %11 : vector<1x1x32xf32> to vector<16x8x32xf32>
    %13 = arith.mulf %9, %12 : vector<16x8x32xf32>
    %cst_9 = arith.constant dense<0.000000e+00> : vector<16x8xf32>
    %14 = vector.multi_reduction <add>, %13, %cst_9 [2] : vector<16x8x32xf32> to vector<16x8xf32>
    %c0_10 = arith.constant 0 : index
    %c0_11 = arith.constant 0 : index
    %15 = vector.load %arg2[%c0_10, %c0_11] : memref<16x8xf32, #tpu.memory_space<vmem>>, vector<16x8xf32>
    %16 = arith.addf %14, %15 : vector<16x8xf32>
    %cst_12 = arith.constant dense<0xFF800000> : vector<16xf32>
    %17 = vector.multi_reduction <maximumf>, %16, %cst_12 [1] : vector<16x8xf32> to vector<16xf32>
    %18 = vector.shape_cast %17 : vector<16xf32> to vector<16x1xf32>
    %19 = vector.broadcast %18 : vector<16x1xf32> to vector<16x8xf32>
    %20 = arith.subf %16, %19 : vector<16x8xf32>
    %21 = math.exp %20 : vector<16x8xf32>
    %cst_13 = arith.constant dense<0.000000e+00> : vector<16xf32>
    %22 = vector.multi_reduction <add>, %21, %cst_13 [1] : vector<16x8xf32> to vector<16xf32>
    %23 = vector.shape_cast %22 : vector<16xf32> to vector<16x1xf32>
    %24 = tpu.reciprocal %23 : vector<16x1xf32> -> vector<16x1xf32>
    %25 = vector.broadcast %24 : vector<16x1xf32> to vector<16x8xf32>
    %26 = arith.mulf %21, %25 : vector<16x8xf32>
    %27 = vector.shape_cast %26 : vector<16x8xf32> to vector<16x8x1xf32>
    %28 = vector.broadcast %27 : vector<16x8x1xf32> to vector<16x8x32xf32>
    %29 = arith.mulf %0, %28 : vector<16x8x32xf32>
    %cst_14 = arith.constant dense<0.000000e+00> : vector<16x32xf32>
    %30 = vector.multi_reduction <add>, %29, %cst_14 [1] : vector<16x8x32xf32> to vector<16x32xf32>
    %c0_15 = arith.constant 0 : index
    %c0_16 = arith.constant 0 : index
    %31 = vector.load %arg6[%c0_15, %c0_16] : memref<16x32xf32, #tpu.memory_space<vmem>>, vector<16x32xf32>
    tpu.vector_store %arg6[%c0_15, %c0_16], %30 {strides = array<i32>} : memref<16x32xf32, #tpu.memory_space<vmem>>, vector<16x32xf32>,
    return
  }
  func.func @transform_0(%arg0: i32) -> (i32, i32, i32) {
    %c0_i32 = arith.constant 0 : i32
    %c0_i32_0 = arith.constant 0 : i32
    %c0_i32_1 = arith.constant 0 : i32
    return %arg0, %c0_i32, %c0_i32_0 : i32, i32, i32
  }
  func.func @transform_1(%arg0: i32) -> (i32, i32) {
    %c0_i32 = arith.constant 0 : i32
    %c0_i32_0 = arith.constant 0 : i32
    return %arg0, %c0_i32 : i32, i32
  }
  func.func @transform_2(%arg0: i32) -> (i32, i32) {
    %c0_i32 = arith.constant 0 : i32
    %c0_i32_0 = arith.constant 0 : i32
    %c0_i32_1 = arith.constant 0 : i32
    return %c0_i32, %c0_i32_0 : i32, i32
  }
  func.func @transform_3(%arg0: i32) -> (i32, i32) {
    %c0_i32 = arith.constant 0 : i32
    %c0_i32_0 = arith.constant 0 : i32
    %c0_i32_1 = arith.constant 0 : i32
    return %c0_i32, %c0_i32_0 : i32, i32
  }
  func.func @transform_4(%arg0: i32) -> (i32, i32) {
    %c0_i32 = arith.constant 0 : i32
    %c0_i32_0 = arith.constant 0 : i32
    %c0_i32_1 = arith.constant 0 : i32
    return %c0_i32, %c0_i32_0 : i32, i32
  }
  func.func @transform_5(%arg0: i32) -> (i32, i32) {
    %c0_i32 = arith.constant 0 : i32
    %c0_i32_0 = arith.constant 0 : i32
    return %arg0, %c0_i32 : i32, i32
  }
}

</mosaic_0001>

<bundles_post_ra>
// kernel: tpu_custom_call.1
= control target key start
LH: loop header
LB: loop body
LE: loop exit
PB: predicated region body
PF: predicated region fallthrough
CT: control target
= control target key end

     0   :  { %10 = vsyncpa [#allocation3], 0  ;;  %s2047_s0 = inlined_call_operand.hbm [shape: f32[16,8,32], index: 0, kind: input, shape index: {}]   ;;  %s2048_s1 = inlined_call_operand.vmem [shape: f32[16,8], index: 1, kind: input, shape index: {}]   ;;  %s2049_s2 = inlined_call_operand.hbm [shape: f32[32,32], index: 2, kind: input, shape index: {}]   ;;  %s2050_s3 = inlined_call_operand.vmem [shape: f32[1,32], index: 3, kind: input, shape index: {}]   ;;  %s2051_s4 = inlined_call_operand.vmem [shape: f32[1,32], index: 4, kind: input, shape index: {}]   ;;  %s2052_s5 = inlined_call_operand.hbm [shape: f32[16,32], index: 5, kind: output, shape index: {}]  }
   0x1   :  { %11 = vsyncpa [#allocation6], 0 }
   0x2   :  { %12 = vsyncpa [#allocation4], 0  ;;  %s1513_s18 = smov [#allocation2]   ;;  %s1441_s22 = scalar_lea.hbm %s2047_s0, 2048 }
   0x3   :  { %s18_s19 = sshll.u32 %s1513_s18, 4  ;;  %p1442_p0 = scmp.ne.s32.totalorder %s2047_s0, %s1441_s22  ;;  %s19_s19 = int_to_ptr.vmem [resolvable:$true] %s18_s19 }
   0x4   :  { %p1445_p1 = scmp.lt.u32.totalorder %s1441_s22, %s2047_s0 }
   0x6   :  { %p1447_p2 = pnand %p1445_p1, %p1442_p0 }
   0x8   :  { %1450 = shalt.err (!%p1447_p2)
}
   0x9   :  { %s1451_s27 = scalar_lea.vmem %s19_s19, 2048  ;;  %p1456_p4 = scmp.lt.s32.totalorder %s19_s19, %s19_s19 }
   0xa   :  { %p1452_p3 = scmp.ne.s32.totalorder %s19_s19, %s1451_s27  ;;  %p1457_p5 = scmp.lt.s32.totalorder %s1451_s27, %s1451_s27 }
   0xc   :  { %p1458_p6 = por %p1457_p5, %p1456_p4 }
   0xe   :  { %p1459_p7 = pnand %p1458_p6, %p1452_p3 }
  0x10   :  { %1462 = shalt.err (!%p1459_p7)
}
  0x11   :  { %s1514_s28 = smov 128   ;;  %s1515_s29 = smov 8  }
  0x12   :  { %24 = dma.hbm_to_vmem [thread:$0]  %s2047_s0, 2048, %s19_s19, [#allocation3], %s1514_s28, %s1514_s28, %s1515_s29  }
  0x13   :  { %s1516_s7 = smov [#allocation5]   ;;  %s1463_s11 = scalar_lea.hbm %s2049_s2, 512 }
  0x14   :  { %s32_s8 = sshll.u32 %s1516_s7, 4  ;;  %p1464_p8 = scmp.ne.s32.totalorder %s2049_s2, %s1463_s11  ;;  %s33_s8 = int_to_ptr.vmem [resolvable:$true] %s32_s8 }
  0x15   :  { %p1467_p9 = scmp.lt.u32.totalorder %s1463_s11, %s2049_s2 }
  0x17   :  { %p1469_p10 = pnand %p1467_p9, %p1464_p8 }
  0x19   :  { %1472 = shalt.err (!%p1469_p10)
}
  0x1a   :  { %s1473_s16 = scalar_lea.vmem %s33_s8, 512  ;;  %p1478_p12 = scmp.lt.s32.totalorder %s33_s8, %s33_s8 }
  0x1b   :  { %p1474_p11 = scmp.ne.s32.totalorder %s33_s8, %s1473_s16  ;;  %p1479_p13 = scmp.lt.s32.totalorder %s1473_s16, %s1473_s16 }
  0x1d   :  { %p1480_p0 = por %p1479_p13, %p1478_p12 }
  0x1f   :  { %p1481_p1 = pnand %p1480_p0, %p1474_p11 }
  0x21   :  { %1484 = shalt.err (!%p1481_p1)
}
  0x22   :  { %38 = dma.hbm_to_vmem [thread:$0]  %s2049_s2, 512, %s33_s8, [#allocation6], %s1514_s28, %s1514_s28, %s1515_s29  }
  0x23   :  { %1507 = dma.done.wait [#allocation3], 2048  }
  0x24   :  { %1508 = vsyncadd [#allocation3], 4294965248 }
  0x25   :  { %1509 = dma.done.wait [#allocation6], 512  }
  0x26   :  { %1510 = vsyncadd [#allocation6], 4294966784  ;;  %v361_v0 = vlaneseq  ;;  %vm76_vm0 = vcmask 261120   ;;  %v65_v2 = vld [vmem:[#allocation5] sm:$0xff]  ;;  %v66_v3 = vld [vmem:[#allocation5 + $0x8] sm:$0xff]  ;;  %vm635_vm1 = vcmask 1041409  }
  0x27   :  { %v67_v4 = vld [vmem:[#allocation5 + $0x10] sm:$0xff]  ;;  %v1375_v5 = vpack.c.bf16 %v66_v3, %v65_v2  ;;  %v68_v6 = vld [vmem:[#allocation5 + $0x18] sm:$0xff]  ;;  %v49_v7 = vld [vmem:[#allocation2] sm:$0xff]  ;;  %vm637_vm2 = vcmask 1042434   ;;  %vm639_vm3 = vcmask 1043459   ;;  %vm641_vm4 = vcmask 1044484  }
  0x28   :  { %v1580_v1 = vshrl.u32 %v361_v0, 7  ;;  %v57_v8 = vld [vmem:[#allocation2 + $0x40] sm:$0xff]  ;;  %v1379_v9 = vpack.c.bf16 %v68_v6, %v67_v4  ;;  %1351 = vmatprep.mubr.msk.f32.mxu0 %vm76_vm0, %v49_v7  ;;  %v1600_v14 = vld [vmem:[%s2048_s1 + $0x8] sm:$0xff]  ;;  %v1611_v19 = vld [vmem:[#allocation2 + $0x10] sm:$0xff]  ;;  %vm643_vm5 = vcmask 1045509   ;;  %vm645_vm6 = vcmask 1046534  }
  0x29   :  { %1363 = vmatprep.mubr.msk.f32.mxu1 %vm76_vm0, %v57_v8  ;;  %1376 = vmatprep.subr.bf16.mxu0 %v1375_v5  ;;  %v1593_v12 = vld [vmem:[%s2048_s1] sm:$0xff]  ;;  %v1607_v17 = vld [vmem:[#allocation2 + $0x8] sm:$0xff]  ;;  %v1613_v20 = vld [vmem:[#allocation2 + $0x50] sm:$0xff]  ;;  %vm647_vm7 = vcmask 1047559   ;;  %vm658_vm8 = vcmask 64512  }
  0x2a   :  { %1383 = vmatprep.subr.bf16.mxu1 %v1375_v5  ;;  %v1585_v10 = vsub.s32 1, %v1580_v1  ;;  %1378 = vmatpush3.bf16.msra.mxu0 %v1375_v5  ;;  %v1588_v11 = vsub.s32 0, %v1580_v1  ;;  %v1603_v15 = vsub.s32 2, %v1580_v1  ;;  %v1609_v18 = vld [vmem:[#allocation2 + $0x48] sm:$0xff]  ;;  %v1624_v23 = vsub.s32 3, %v1580_v1  ;;  %v1628_v24 = vld [vmem:[#allocation2 + $0x18] sm:$0xff] }
  0x2b   :  { %1385 = vmatpush3.bf16.msra.mxu1 %v1375_v5  ;;  %1380 = vmatprep.subr.bf16.mxu0 %v1379_v9  ;;  %v1632_v25 = vld [vmem:[#allocation2 + $0x58] sm:$0xff]  ;;  %v53_v26 = vld [vmem:[#allocation2 + $0x20] sm:$0xff]  ;;  %v1643_v30 = vsub.s32 4, %v1580_v1  ;;  %v54_v31 = vld [vmem:[#allocation2 + $0x28] sm:$0xff]  ;;  %v1654_v37 = vsub.s32 5, %v1580_v1  ;;  %v1665_v42 = vsub.s32 6, %v1580_v1 }
  0x2c   :  { %1384 = vmatprep.subr.bf16.mxu1 %v1379_v9  ;;  %v371_v13 = vrot.slane %v1593_v12, %v1585_v10  ;;  %v364_v16 = vrot.slane %v1593_v12, %v1588_v11  ;;  %v420_v21 = vrot.slane %v1600_v14, %v1588_v11  ;;  %v378_v22 = vrot.slane %v1593_v12, %v1603_v15  ;;  %v61_v27 = vld [vmem:[#allocation2 + $0x60] sm:$0xff]  ;;  %v62_v32 = vld [vmem:[#allocation2 + $0x68] sm:$0xff]  ;;  %v55_v33 = vld [vmem:[#allocation2 + $0x30] sm:$0xff] }
  0x2d   :  { %v427_v28 = vrot.slane %v1600_v14, %v1585_v10  ;;  %v385_v29 = vrot.slane %v1593_v12, %v1624_v23  ;;  %v63_v34 = vld [vmem:[#allocation2 + $0x70] sm:$0xff]  ;;  %v434_v35 = vrot.slane %v1600_v14, %v1603_v15  ;;  %v392_v36 = vrot.slane %v1593_v12, %v1643_v30  ;;  %v56_v38 = vld [vmem:[#allocation2 + $0x38] sm:$0xff]  ;;  %v1678_v47 = vld [vmem:[%s2050_s3] ss:$0 sm:$0xff]  ;;  %s1518_s3 = smov [#allocation7]  }
  0x2e   :  { %1382 = vmatpush3.bf16.msra.mxu0 %v1379_v9  ;;  %373 = vbcast.lane.b32.xlu1 %v371_v13, 256  ;;  %v64_v39 = vld [vmem:[#allocation2 + $0x78] sm:$0xff]  ;;  %v441_v40 = vrot.slane %v1600_v14, %v1624_v23  ;;  %v399_v41 = vrot.slane %v1593_v12, %v1654_v37  ;;  %v448_v43 = vrot.slane %v1600_v14, %v1643_v30  ;;  %v1687_v56 = vld [vmem:[%s2051_s4] ss:$0 sm:$0xff]  ;;  %s1292_s4 = sshll.u32 %s1518_s3, 4  ;;  %s1293_s4 = int_to_ptr.vmem [resolvable:$true] %s1292_s4 }
  0x2f   :  { %1386 = vmatpush3.bf16.msra.mxu1 %v1379_v9  ;;  %366 = vbcast.lane.b32.xlu0 %v364_v16, 256  ;;  %v406_v44 = vrot.slane %v1593_v12, %v1665_v42  ;;  %v455_v45 = vrot.slane %v1600_v14, %v1654_v37  ;;  %v462_v46 = vrot.slane %v1600_v14, %v1665_v42  ;;  %s1485_s24 = scalar_lea.vmem %s1293_s4, 256  ;;  %p1490_p3 = scmp.lt.s32.totalorder %s1293_s4, %s1293_s4 }
  0x30   :  { %p1486_p2 = scmp.ne.s32.totalorder %s1293_s4, %s1485_s24  ;;  %p1491_p4 = scmp.lt.s32.totalorder %s1485_s24, %s1485_s24 }
  0x31   :  { %1352 = vmatmul.mubr.msk.f32.vlgmr.msra.gmra.mrb[0].mxu0 %vm76_vm0, %v1607_v17 }
  0x32   :  { %1364 = vmatmul.mubr.msk.f32.vlgmr.msra.gmra.mrb[0].mxu1 %vm76_vm0, %v1609_v18  ;;  %1354 = vmatprep.mubr.msk.f32.mxu0 %vm76_vm0, %v1611_v19  ;;  %p1492_p5 = por %p1491_p4, %p1490_p3 }
  0x33   :  { %1366 = vmatprep.mubr.msk.f32.mxu1 %vm76_vm0, %v1613_v20  ;;  %422 = vbcast.lane.b32.xlu1 %v420_v21, 256 }
  0x34   :  { %380 = vbcast.lane.b32.xlu0 %v378_v22, 256  ;;  %p1493_p6 = pnand %p1492_p5, %p1486_p2 }
  0x35   :  { %1355 = vmatmul.mubr.msk.f32.gmra.mrb[2].mxu0 %vm76_vm0, %v1628_v24 }
  0x36   :  { %1367 = vmatmul.mubr.msk.f32.gmra.mrb[2].mxu1 %vm76_vm0, %v1632_v25  ;;  %1357 = vmatprep.mubr.msk.f32.mxu0 %vm76_vm0, %v53_v26 }
  0x37   :  { %1369 = vmatprep.mubr.msk.f32.mxu1 %vm76_vm0, %v61_v27  ;;  %429 = vbcast.lane.b32.xlu1 %v427_v28, 256 }
  0x38   :  { %387 = vbcast.lane.b32.xlu0 %v385_v29, 256 }
  0x39   :  { %1358 = vmatmul.mubr.msk.f32.gmra.mrb[4].mxu0 %vm76_vm0, %v54_v31 }
  0x3a   :  { %1370 = vmatmul.mubr.msk.f32.gmra.mrb[4].mxu1 %vm76_vm0, %v62_v32  ;;  %1360 = vmatprep.mubr.msk.f32.mxu0 %vm76_vm0, %v55_v33 }
  0x3b   :  { %1372 = vmatprep.mubr.msk.f32.mxu1 %vm76_vm0, %v63_v34  ;;  %436 = vbcast.lane.b32.xlu1 %v434_v35, 256 }
  0x3c   :  { %394 = vbcast.lane.b32.xlu0 %v392_v36, 256 }
  0x3d   :  { %1361 = vmatmul.mubr.msk.f32.gmra.mrb[6].mxu0 %vm76_vm0, %v56_v38 }
  0x3e   :  { %1373 = vmatmul.mubr.msk.f32.gmra.mrb[6].mxu1 %vm76_vm0, %v64_v39 }
  0x3f   :  { %443 = vbcast.lane.b32.xlu1 %v441_v40, 256 }
  0x40   :  { %401 = vbcast.lane.b32.xlu0 %v399_v41, 256 }
  0x43   :  { %450 = vbcast.lane.b32.xlu1 %v448_v43, 256 }
  0x44   :  { %408 = vbcast.lane.b32.xlu0 %v406_v44, 256 }
  0x47   :  { %457 = vbcast.lane.b32.xlu1 %v455_v45, 256 }
  0x4b   :  { %464 = vbcast.lane.b32.xlu1 %v462_v46, 256 }
 0x104   :  { %v1353_v48 = vpop.f32.mrb[0].mxu0 }
 0x105   :  { %v1365_v49 = vpop.f32.mrb[0].mxu1  ;;  %v197_v50 = vadd.f32 %v1353_v48, %v1678_v47  ;;  %v191_v52 = vpop.f32.mrb[1].mxu0 }
 0x106   :  { %v237_v51 = vadd.f32 %v1365_v49, %v1678_v47  ;;  %v231_v53 = vpop.f32.mrb[1].mxu1  ;;  %v192_v54 = vadd.f32 %v1678_v47, %v191_v52 }
 0x107   :  { %v232_v55 = vadd.f32 %v1678_v47, %v231_v53  ;;  %v271_v57 = vmax.f32 %v197_v50, 0.0 }
 0x108   :  { %v279_v58 = vmax.f32 %v237_v51, 0.0  ;;  %v270_v59 = vmax.f32 %v192_v54, 0.0  ;;  %v1356_v61 = vpop.f32.mrb[2].mxu0 }
 0x109   :  { %v278_v60 = vmax.f32 %v232_v55, 0.0  ;;  %v1368_v62 = vpop.f32.mrb[2].mxu1  ;;  %v207_v63 = vadd.f32 %v1356_v61, %v1678_v47  ;;  %v294_v4 = vmul.f32 %v1687_v56, %v271_v57  ;;  %v201_v5 = vpop.f32.mrb[3].mxu0 }
 0x10a   :  { %v302_v2 = vmul.f32 %v1687_v56, %v279_v58  ;;  %v247_v3 = vadd.f32 %v1368_v62, %v1678_v47  ;;  %v241_v6 = vpop.f32.mrb[3].mxu1  ;;  %v202_v7 = vadd.f32 %v1678_v47, %v201_v5  ;;  %v293_v13 = vmul.f32 %v1687_v56, %v270_v59 }
 0x10b   :  { %v242_v8 = vadd.f32 %v1678_v47, %v241_v6  ;;  %v301_v9 = vmul.f32 %v1687_v56, %v278_v60  ;;  %v273_v16 = vmax.f32 %v207_v63, 0.0  ;;  %v312_v26 = vsel %vm76_vm0, %v294_v4, 0.0 }
 0x10c   :  { %v336_v21 = vsel %vm76_vm0, %v302_v2, 0.0  ;;  %v281_v22 = vmax.f32 %v247_v3, 0.0  ;;  %313 = vadd.xlane.f32.xlu0 %v312_v26  ;;  %v1359_v29 = vpop.f32.mrb[4].mxu0  ;;  %v272_v39 = vmax.f32 %v202_v7, 0.0  ;;  %v309_v40 = vsel %vm76_vm0, %v293_v13, 0.0 }
 0x10d   :  { %337 = vadd.xlane.f32.xlu1 %v336_v21  ;;  %v280_v27 = vmax.f32 %v242_v8, 0.0  ;;  %v333_v28 = vsel %vm76_vm0, %v301_v9, 0.0  ;;  %v1371_v31 = vpop.f32.mrb[4].mxu1  ;;  %v217_v32 = vadd.f32 %v1359_v29, %v1678_v47  ;;  %v211_v35 = vpop.f32.mrb[5].mxu0  ;;  %v296_v36 = vmul.f32 %v1687_v56, %v273_v16 }
 0x10e   :  { %v257_v33 = vadd.f32 %v1371_v31, %v1678_v47  ;;  %v304_v34 = vmul.f32 %v1687_v56, %v281_v22  ;;  %v251_v38 = vpop.f32.mrb[5].mxu1  ;;  %v212_v53 = vadd.f32 %v1678_v47, %v211_v35  ;;  %v295_v54 = vmul.f32 %v1687_v56, %v272_v39 }
 0x10f   :  { %v252_v41 = vadd.f32 %v1678_v47, %v251_v38  ;;  %v303_v43 = vmul.f32 %v1687_v56, %v280_v27  ;;  %v275_v46 = vmax.f32 %v217_v32, 0.0  ;;  %v318_v50 = vsel %vm76_vm0, %v296_v36, 0.0 }
 0x110   :  { %310 = vadd.xlane.f32.xlu0 %v309_v40  ;;  %v1362_v44 = vpop.f32.mrb[6].mxu0  ;;  %v283_v48 = vmax.f32 %v257_v33, 0.0  ;;  %v342_v49 = vsel %vm76_vm0, %v304_v34, 0.0  ;;  %v274_v62 = vmax.f32 %v212_v53, 0.0  ;;  %v315_v63 = vsel %vm76_vm0, %v295_v54, 0.0 }
 0x111   :  { %334 = vadd.xlane.f32.xlu1 %v333_v28  ;;  %v1374_v45 = vpop.f32.mrb[6].mxu1  ;;  %v221_v51 = vpop.f32.mrb[7].mxu0  ;;  %v282_v55 = vmax.f32 %v252_v41, 0.0  ;;  %v339_v57 = vsel %vm76_vm0, %v303_v43, 0.0  ;;  %v227_v58 = vadd.f32 %v1362_v44, %v1678_v47  ;;  %v298_v61 = vmul.f32 %v1687_v56, %v275_v46 }
 0x112   :  { %v261_v52 = vpop.f32.mrb[7].mxu1  ;;  %v267_v59 = vadd.f32 %v1374_v45, %v1678_v47  ;;  %v306_v60 = vmul.f32 %v1687_v56, %v283_v48  ;;  %v222_v8 = vadd.f32 %v1678_v47, %v221_v51  ;;  %v297_v9 = vmul.f32 %v1687_v56, %v274_v62  ;;  %v367_v41 = vpop.permute.xlu0 %366 }
 0x113   :  { %v262_v2 = vadd.f32 %v1678_v47, %v261_v52  ;;  %v305_v3 = vmul.f32 %v1687_v56, %v282_v55  ;;  %v277_v4 = vmax.f32 %v227_v58, 0.0  ;;  %v324_v7 = vsel %vm76_vm0, %v298_v61, 0.0 }
 0x114   :  { %319 = vadd.xlane.f32.xlu0 %v318_v50  ;;  %v285_v5 = vmax.f32 %v267_v59, 0.0  ;;  %v348_v6 = vsel %vm76_vm0, %v306_v60, 0.0  ;;  %v1517_v13 = vmov 0   ;;  %v276_v27 = vmax.f32 %v222_v8, 0.0 }
 0x115   :  { %343 = vadd.xlane.f32.xlu1 %v342_v49  ;;  %1394 = vset.pattern.permute.xlu0 %v1517_v13  ;;  %v284_v16 = vmax.f32 %v262_v2, 0.0  ;;  %v345_v21 = vsel %vm76_vm0, %v305_v3, 0.0  ;;  %v300_v26 = vmul.f32 %v1687_v56, %v277_v4  ;;  %v321_v28 = vsel %vm76_vm0, %v297_v9, 0.0 }
 0x116   :  { %1393 = vset.pattern.permute.xlu1 %v1517_v13  ;;  %v308_v22 = vmul.f32 %v1687_v56, %v285_v5  ;;  %v299_v32 = vmul.f32 %v1687_v56, %v276_v27  ;;  %v1734_v35 = vsub.s32 7, %v1580_v1  ;;  %v381_v44 = vpop.permute.xlu0 %380 }
 0x117   :  { %v330_v29 = vsel %vm76_vm0, %v300_v26, 0.0  ;;  %v307_v31 = vmul.f32 %v1687_v56, %v284_v16  ;;  %v374_v56 = vpop.permute.xlu1 %373 }
 0x118   :  { %316 = vadd.xlane.f32.xlu0 %v315_v63  ;;  %v354_v47 = vsel %vm76_vm0, %v308_v22, 0.0  ;;  %v327_v34 = vsel %vm76_vm0, %v299_v32, 0.0  ;;  %v469_v36 = vrot.slane %v1600_v14, %v1734_v35  ;;  %v413_v38 = vrot.slane %v1593_v12, %v1734_v35 }
 0x119   :  { %340 = vadd.xlane.f32.xlu1 %v339_v57  ;;  %v351_v33 = vsel %vm76_vm0, %v307_v31, 0.0 }
 0x11a   :  { %v388_v46 = vpop.permute.xlu0 %387 }
 0x11b   :  { %v423_v39 = vpop.permute.xlu1 %422 }
 0x11c   :  { %325 = vadd.xlane.f32.xlu0 %v324_v7 }
 0x11d   :  { %349 = vadd.xlane.f32.xlu1 %v348_v6 }
 0x11e   :  { %v395_v49 = vpop.permute.xlu0 %394 }
 0x11f   :  { %v430_v40 = vpop.permute.xlu1 %429 }
 0x120   :  { %322 = vadd.xlane.f32.xlu0 %v321_v28 }
 0x121   :  { %346 = vadd.xlane.f32.xlu1 %v345_v21 }
 0x122   :  { %v402_v51 = vpop.permute.xlu0 %401 }
 0x123   :  { %v437_v43 = vpop.permute.xlu1 %436 }
 0x124   :  { %331 = vadd.xlane.f32.xlu0 %v330_v29 }
 0x125   :  { %355 = vadd.xlane.f32.xlu1 %v354_v47 }
 0x126   :  { %v409_v53 = vpop.permute.xlu0 %408 }
 0x127   :  { %v444_v45 = vpop.permute.xlu1 %443 }
 0x128   :  { %328 = vadd.xlane.f32.xlu0 %v327_v34 }
 0x129   :  { %352 = vadd.xlane.f32.xlu1 %v351_v33 }
 0x12b   :  { %v451_v48 = vpop.permute.xlu1 %450 }
 0x12f   :  { %v458_v50 = vpop.permute.xlu1 %457 }
 0x133   :  { %v465_v52 = vpop.permute.xlu1 %464 }
 0x13a   :  { %471 = vbcast.lane.b32.xlu1 %v469_v36, 256 }
 0x13e   :  { %415 = vbcast.lane.b32.xlu0 %v413_v38, 256 }
 0x199   :  { %v314_v54 = vpop.xlane.xlu0 %313 }
 0x19a   :  { %v338_v14 = vpop.xlane.xlu1 %337  ;;  %v1742_v12 = vadd.f32 %v374_v56, %v314_v54 }
 0x19b   :  { %v1740_v55 = vadd.f32 %v430_v40, %v338_v14 }
 0x19c   :  { %525 = vperm.xlu1 %1393, %v1742_v12  }
 0x19d   :  { %549 = vperm.xlu0 %1394, %v1740_v55   ;;  %v311_v58 = vpop.xlane.xlu0 %310 }
 0x19e   :  { %v335_v57 = vpop.xlane.xlu1 %334  ;;  %v1748_v60 = vadd.f32 %v367_v41, %v311_v58 }
 0x19f   :  { %v1746_v59 = vadd.f32 %v423_v39, %v335_v57 }
 0x1a1   :  { %546 = vperm.xlu1 %1393, %v1746_v59   ;;  %522 = vperm.xlu0 %1394, %v1748_v60   ;;  %v320_v62 = vpop.xlane.xlu0 %319 }
 0x1a2   :  { %v344_v61 = vpop.xlane.xlu1 %343  ;;  %v1754_v2 = vadd.f32 %v388_v46, %v320_v62 }
 0x1a3   :  { %v1752_v63 = vadd.f32 %v444_v45, %v344_v61 }
 0x1a5   :  { %555 = vperm.xlu0 %1394, %v1752_v63   ;;  %531 = vperm.xlu1 %1393, %v1754_v2   ;;  %v317_v4 = vpop.xlane.xlu0 %316 }
 0x1a6   :  { %v341_v3 = vpop.xlane.xlu1 %340  ;;  %v1760_v6 = vadd.f32 %v381_v44, %v317_v4 }
 0x1a7   :  { %v1758_v5 = vadd.f32 %v437_v43, %v341_v3 }
 0x1a9   :  { %552 = vperm.xlu0 %1394, %v1758_v5   ;;  %528 = vperm.xlu1 %1393, %v1760_v6   ;;  %v326_v8 = vpop.xlane.xlu0 %325 }
 0x1aa   :  { %v350_v7 = vpop.xlane.xlu1 %349  ;;  %v1766_v13 = vadd.f32 %v402_v51, %v326_v8 }
 0x1ab   :  { %v1764_v9 = vadd.f32 %v458_v50, %v350_v7 }
 0x1ad   :  { %561 = vperm.xlu0 %1394, %v1764_v9   ;;  %537 = vperm.xlu1 %1393, %v1766_v13   ;;  %v323_v21 = vpop.xlane.xlu0 %322 }
 0x1ae   :  { %v347_v16 = vpop.xlane.xlu1 %346  ;;  %v1772_v26 = vadd.f32 %v395_v49, %v323_v21 }
 0x1af   :  { %v1770_v22 = vadd.f32 %v451_v48, %v347_v16  ;;  %v570_v48 = vand.u32 127, %v361_v0 }
 0x1b1   :  { %558 = vperm.xlu0 %1394, %v1770_v22   ;;  %534 = vperm.xlu1 %1393, %v1772_v26   ;;  %v332_v28 = vpop.xlane.xlu0 %331  ;;  %v1790_v51 = vsub.s32 %v570_v48, %v1580_v1 }
 0x1b2   :  { %v356_v27 = vpop.xlane.xlu1 %355 }
 0x1b5   :  { %v329_v29 = vpop.xlane.xlu0 %328 }
 0x1b6   :  { %v353_v47 = vpop.xlane.xlu1 %352  ;;  %v1778_v32 = vadd.f32 %v409_v53, %v329_v29 }
 0x1b7   :  { %v1776_v31 = vadd.f32 %v465_v52, %v353_v47 }
 0x1b8   :  { %540 = vperm.xlu1 %1393, %v1778_v32  }
 0x1b9   :  { %564 = vperm.xlu0 %1394, %v1776_v31   ;;  %v416_v34 = vpop.permute.xlu0 %415 }
 0x1ba   :  { %v472_v33 = vpop.permute.xlu1 %471  ;;  %v1784_v38 = vadd.f32 %v416_v34, %v332_v28 }
 0x1bb   :  { %v1782_v36 = vadd.f32 %v472_v33, %v356_v27 }
 0x1bc   :  { %543 = vperm.xlu1 %1393, %v1784_v38  }
 0x1bd   :  { %567 = vperm.xlu0 %1394, %v1782_v36  }
 0x21b   :  { %v526_v56 = vpop.permute.xlu1 %525 }
 0x21c   :  { %v550_v39 = vpop.permute.xlu0 %549  ;;  %v578_v57 = vrot.slane %v526_v56, %v1790_v51 }
 0x21d   :  { %v610_v58 = vrot.slane %v550_v39, %v1790_v51 }
 0x220   :  { %v547_v40 = vpop.permute.xlu1 %546  ;;  %v523_v41 = vpop.permute.xlu0 %522 }
 0x221   :  { %v606_v52 = vrot.slane %v547_v40, %v1790_v51  ;;  %v574_v53 = vrot.slane %v523_v41, %v1790_v51 }
 0x223   :  { %v649_v62 = vsel %vm635_vm1, %v610_v58, %v606_v52  ;;  %v636_v1 = vsel %vm635_vm1, %v578_v57, %v574_v53 }
 0x224   :  { %v532_v43 = vpop.permute.xlu1 %531  ;;  %v556_v44 = vpop.permute.xlu0 %555 }
 0x225   :  { %v586_v16 = vrot.slane %v532_v43, %v1790_v51  ;;  %v618_v21 = vrot.slane %v556_v44, %v1790_v51 }
 0x228   :  { %v529_v45 = vpop.permute.xlu1 %528  ;;  %v553_v46 = vpop.permute.xlu0 %552 }
 0x229   :  { %v582_v14 = vrot.slane %v529_v45, %v1790_v51  ;;  %v614_v54 = vrot.slane %v553_v46, %v1790_v51 }
 0x22b   :  { %v638_v3 = vsel %vm637_vm2, %v582_v14, %v636_v1  ;;  %v650_v4 = vsel %vm637_vm2, %v614_v54, %v649_v62 }
 0x22c   :  { %v538_v49 = vpop.permute.xlu1 %537  ;;  %v562_v50 = vpop.permute.xlu0 %561  ;;  %v640_v47 = vsel %vm639_vm3, %v586_v16, %v638_v3  ;;  %v651_v29 = vsel %vm639_vm3, %v618_v21, %v650_v4 }
 0x22d   :  { %v594_v40 = vrot.slane %v538_v49, %v1790_v51  ;;  %v626_v41 = vrot.slane %v562_v50, %v1790_v51 }
 0x230   :  { %v535_v0 = vpop.permute.xlu1 %534  ;;  %v559_v61 = vpop.permute.xlu0 %558 }
 0x231   :  { %v590_v7 = vrot.slane %v535_v0, %v1790_v51  ;;  %v622_v8 = vrot.slane %v559_v61, %v1790_v51 }
 0x233   :  { %v642_v33 = vsel %vm641_vm4, %v590_v7, %v640_v47  ;;  %v652_v34 = vsel %vm641_vm4, %v622_v8, %v651_v29 }
 0x234   :  { %v644_v48 = vsel %vm643_vm5, %v594_v40, %v642_v33  ;;  %v653_v52 = vsel %vm643_vm5, %v626_v41, %v652_v34 }
 0x237   :  { %v541_v27 = vpop.permute.xlu1 %540 }
 0x238   :  { %v565_v28 = vpop.permute.xlu0 %564  ;;  %v598_v56 = vrot.slane %v541_v27, %v1790_v51 }
 0x239   :  { %v630_v39 = vrot.slane %v565_v28, %v1790_v51 }
 0x23a   :  { %v646_v53 = vsel %vm645_vm6, %v598_v56, %v644_v48 }
 0x23b   :  { %v544_v43 = vpop.permute.xlu1 %543  ;;  %v654_v14 = vsel %vm645_vm6, %v630_v39, %v653_v52 }
 0x23c   :  { %v568_v44 = vpop.permute.xlu0 %567  ;;  %v602_v45 = vrot.slane %v544_v43, %v1790_v51 }
 0x23d   :  { %v634_v46 = vrot.slane %v568_v44, %v1790_v51 }
 0x23e   :  { %v648_v49 = vsel %vm647_vm7, %v602_v45, %v646_v53 }
 0x23f   :  { %v655_v50 = vsel %vm647_vm7, %v634_v46, %v654_v14  ;;  %v659_v54 = vsel %vm658_vm8, %v648_v49, -inf }
 0x240   :  { %v662_v57 = vsel %vm658_vm8, %v655_v50, -inf  ;;  %660 = vmax.xlane.f32.xlu1 %v659_v54 }
 0x241   :  { %663 = vmax.xlane.f32.xlu0 %v662_v57 }
 0x2cd   :  { %v1824_v58 = vpop.xlane.xlu1 %660 }
 0x2ce   :  { %v670_v0 = vrot.slane %v1824_v58, %v1588_v11  ;;  %v674_v61 = vrot.slane %v1824_v58, %v1585_v10  ;;  %v1830_v62 = vpop.xlane.xlu0 %663  ;;  %v678_v21 = vrot.slane %v1824_v58, %v1603_v15  ;;  %v682_v28 = vrot.slane %v1824_v58, %v1624_v23 }
 0x2cf   :  { %v702_v8 = vrot.slane %v1830_v62, %v1588_v11  ;;  %v706_v16 = vrot.slane %v1830_v62, %v1585_v10  ;;  %v710_v27 = vrot.slane %v1830_v62, %v1603_v15  ;;  %v714_v29 = vrot.slane %v1830_v62, %v1624_v23 }
 0x2d0   :  { %v747_v1 = vsub.f32 %v1748_v60, %v670_v0  ;;  %v748_v3 = vsub.f32 %v1742_v12, %v674_v61  ;;  %v749_v47 = vsub.f32 %v1760_v6, %v678_v21  ;;  %v686_v39 = vrot.slane %v1824_v58, %v1643_v30 }
 0x2d1   :  { %v755_v60 = vsub.f32 %v1746_v59, %v702_v8  ;;  %v756_v12 = vsub.f32 %v1740_v55, %v706_v16  ;;  %v757_v33 = vsub.f32 %v1758_v5, %v710_v27  ;;  %v750_v40 = vsub.f32 %v1754_v2, %v682_v28 }
 0x2d2   :  { %v763_v4 = vmul.f32 1.442695, %v747_v1  ;;  %v765_v7 = vmul.f32 1.442695, %v748_v3  ;;  %v767_v59 = vmul.f32 1.442695, %v749_v47  ;;  %v718_v55 = vrot.slane %v1830_v62, %v1643_v30 }
 0x2d3   :  { %v779_v34 = vmul.f32 1.442695, %v755_v60  ;;  %v781_v56 = vmul.f32 1.442695, %v756_v12  ;;  %v758_v41 = vsub.f32 %v1752_v63, %v714_v29  ;;  %v783_v6 = vmul.f32 1.442695, %v757_v33 }
 0x2d4   :  { %1395 = vpow2.f32 %v763_v4  ;;  %v690_v5 = vrot.slane %v1824_v58, %v1654_v37  ;;  %v751_v2 = vsub.f32 %v1772_v26, %v686_v39  ;;  %v769_v45 = vmul.f32 1.442695, %v750_v40 }
 0x2d5   :  { %1397 = vpow2.f32 %v765_v7  ;;  %v722_v63 = vrot.slane %v1830_v62, %v1654_v37  ;;  %v759_v46 = vsub.f32 %v1770_v22, %v718_v55  ;;  %v785_v48 = vmul.f32 1.442695, %v758_v41 }
 0x2d6   :  { %1399 = vpow2.f32 %v779_v34  ;;  %v694_v52 = vrot.slane %v1824_v58, %v1665_v42  ;;  %v752_v53 = vsub.f32 %v1766_v13, %v690_v5  ;;  %v771_v14 = vmul.f32 1.442695, %v751_v2 }
 0x2d7   :  { %1401 = vpow2.f32 %v781_v56  ;;  %v726_v26 = vrot.slane %v1830_v62, %v1665_v42  ;;  %v760_v49 = vsub.f32 %v1764_v9, %v722_v63  ;;  %v787_v50 = vmul.f32 1.442695, %v759_v46 }
 0x2d8   :  { %1403 = vpow2.f32 %v767_v59  ;;  %v698_v22 = vrot.slane %v1824_v58, %v1734_v35  ;;  %v753_v13 = vsub.f32 %v1778_v32, %v694_v52  ;;  %v773_v0 = vmul.f32 1.442695, %v752_v53 }
 0x2d9   :  { %1405 = vpow2.f32 %v783_v6  ;;  %v730_v9 = vrot.slane %v1830_v62, %v1734_v35  ;;  %v761_v61 = vsub.f32 %v1776_v31, %v726_v26  ;;  %v789_v1 = vmul.f32 1.442695, %v760_v49 }
 0x2da   :  { %1407 = vpow2.f32 %v769_v45  ;;  %v754_v58 = vsub.f32 %v1784_v38, %v698_v22  ;;  %v775_v32 = vmul.f32 1.442695, %v753_v13 }
 0x2db   :  { %1409 = vpow2.f32 %v785_v48  ;;  %v762_v7 = vsub.f32 %v1782_v36, %v730_v9  ;;  %v791_v62 = vmul.f32 1.442695, %v761_v61 }
 0x2dc   :  { %1411 = vpow2.f32 %v771_v14  ;;  %v777_v16 = vmul.f32 1.442695, %v754_v58 }
 0x2dd   :  { %1413 = vpow2.f32 %v787_v50  ;;  %v793_v38 = vmul.f32 1.442695, %v762_v7 }
 0x2de   :  { %v1856_v43 = vpop.eup %1395  ;;  %1415 = vpow2.f32 %v773_v0 }
 0x2df   :  { %v1858_v44 = vpop.eup %1397  ;;  %812 = vperm.xlu0 %1394, %v1856_v43   ;;  %1417 = vpow2.f32 %v789_v1 }
 0x2e0   :  { %815 = vperm.xlu1 %1393, %v1858_v44   ;;  %v1874_v54 = vpop.eup %1399  ;;  %1419 = vpow2.f32 %v775_v32 }
 0x2e1   :  { %v1876_v57 = vpop.eup %1401  ;;  %1421 = vpow2.f32 %v791_v62 }
 0x2e2   :  { %v1886_v3 = vpop.eup %1403  ;;  %1423 = vpow2.f32 %v777_v16 }
 0x2e3   :  { %839 = vperm.xlu0 %1394, %v1876_v57   ;;  %v1888_v4 = vpop.eup %1405  ;;  %1425 = vpow2.f32 %v793_v38 }
 0x2e4   :  { %836 = vperm.xlu1 %1393, %v1874_v54   ;;  %v1894_v8 = vpop.eup %1407 }
 0x2e5   :  { %v1896_v31 = vpop.eup %1409 }
 0x2e6   :  { %v1900_v21 = vpop.eup %1411 }
 0x2e7   :  { %842 = vperm.xlu0 %1394, %v1888_v4   ;;  %v1902_v27 = vpop.eup %1413 }
 0x2e8   :  { %818 = vperm.xlu1 %1393, %v1886_v3   ;;  %v1906_v36 = vpop.eup %1415 }
 0x2e9   :  { %v1908_v60 = vpop.eup %1417 }
 0x2ea   :  { %v1912_v12 = vpop.eup %1419 }
 0x2eb   :  { %845 = vperm.xlu0 %1394, %v1896_v31   ;;  %v1914_v28 = vpop.eup %1421 }
 0x2ec   :  { %821 = vperm.xlu1 %1393, %v1894_v8   ;;  %v1918_v47 = vpop.eup %1423 }
 0x2ed   :  { %v1920_v29 = vpop.eup %1425 }
 0x2ef   :  { %848 = vperm.xlu0 %1394, %v1902_v27  }
 0x2f0   :  { %824 = vperm.xlu1 %1393, %v1900_v21  }
 0x2f3   :  { %851 = vperm.xlu0 %1394, %v1908_v60  }
 0x2f4   :  { %827 = vperm.xlu1 %1393, %v1906_v36  }
 0x2f7   :  { %854 = vperm.xlu0 %1394, %v1914_v28  }
 0x2f8   :  { %830 = vperm.xlu1 %1393, %v1912_v12  }
 0x2fb   :  { %857 = vperm.xlu0 %1394, %v1920_v29  }
 0x2fc   :  { %833 = vperm.xlu1 %1393, %v1918_v47  }
 0x35e   :  { %v813_v34 = vpop.permute.xlu0 %812 }
 0x35f   :  { %v816_v33 = vpop.permute.xlu1 %815  ;;  %v862_v63 = vrot.slane %v813_v34, %v1790_v51 }
 0x360   :  { %v866_v45 = vrot.slane %v816_v33, %v1790_v51 }
 0x362   :  { %v840_v39 = vpop.permute.xlu0 %839  ;;  %v923_v13 = vsel %vm635_vm1, %v866_v45, %v862_v63 }
 0x363   :  { %v837_v56 = vpop.permute.xlu1 %836  ;;  %v898_v52 = vrot.slane %v840_v39, %v1790_v51 }
 0x364   :  { %v894_v48 = vrot.slane %v837_v56, %v1790_v51 }
 0x366   :  { %v843_v59 = vpop.permute.xlu0 %842  ;;  %v930_v1 = vsel %vm635_vm1, %v898_v52, %v894_v48 }
 0x367   :  { %v819_v40 = vpop.permute.xlu1 %818  ;;  %v902_v14 = vrot.slane %v843_v59, %v1790_v51 }
 0x368   :  { %v870_v53 = vrot.slane %v819_v40, %v1790_v51 }
 0x369   :  { %v931_v62 = vsel %vm637_vm2, %v902_v14, %v930_v1 }
 0x36a   :  { %v846_v41 = vpop.permute.xlu0 %845  ;;  %v924_v58 = vsel %vm637_vm2, %v870_v53, %v923_v13 }
 0x36b   :  { %v822_v55 = vpop.permute.xlu1 %821  ;;  %v906_v49 = vrot.slane %v846_v41, %v1790_v51 }
 0x36c   :  { %v874_v26 = vrot.slane %v822_v55, %v1790_v51 }
 0x36d   :  { %v932_v33 = vsel %vm639_vm3, %v906_v49, %v931_v62 }
 0x36e   :  { %v849_v5 = vpop.permute.xlu0 %848  ;;  %v925_v16 = vsel %vm639_vm3, %v874_v26, %v924_v58 }
 0x36f   :  { %v825_v6 = vpop.permute.xlu1 %824  ;;  %v910_v0 = vrot.slane %v849_v5, %v1790_v51 }
 0x370   :  { %v878_v50 = vrot.slane %v825_v6, %v1790_v51 }
 0x371   :  { %v933_v39 = vsel %vm641_vm4, %v910_v0, %v932_v33 }
 0x372   :  { %v852_v46 = vpop.permute.xlu0 %851  ;;  %v926_v34 = vsel %vm641_vm4, %v878_v50, %v925_v16 }
 0x373   :  { %v828_v2 = vpop.permute.xlu1 %827  ;;  %v914_v32 = vrot.slane %v852_v46, %v1790_v51 }
 0x374   :  { %v882_v9 = vrot.slane %v828_v2, %v1790_v51 }
 0x375   :  { %v934_v41 = vsel %vm643_vm5, %v914_v32, %v933_v39 }
 0x376   :  { %v855_v61 = vpop.permute.xlu0 %854  ;;  %v927_v40 = vsel %vm643_vm5, %v882_v9, %v926_v34  ;;  %v1431_v34 = vld [vmem:[#allocation2] sm:$0xff] }
 0x377   :  { %v831_v22 = vpop.permute.xlu1 %830  ;;  %v918_v38 = vrot.slane %v855_v61, %v1790_v51 }
 0x378   :  { %v886_v7 = vrot.slane %v831_v22, %v1790_v51 }
 0x379   :  { %v935_v45 = vsel %vm645_vm6, %v918_v38, %v934_v41 }
 0x37a   :  { %v858_v55 = vpop.permute.xlu0 %857  ;;  %v928_v5 = vsel %vm645_vm6, %v886_v7, %v927_v40 }
 0x37b   :  { %v834_v56 = vpop.permute.xlu1 %833  ;;  %v922_v6 = vrot.slane %v858_v55, %v1790_v51  ;;  %v1432_v55 = vld [vmem:[#allocation2 + $0x40] sm:$0xff] }
 0x37c   :  { %v890_v59 = vrot.slane %v834_v56, %v1790_v51 }
 0x37d   :  { %v936_v46 = vsel %vm647_vm7, %v922_v6, %v935_v45 }
 0x37e   :  { %v929_v2 = vsel %vm647_vm7, %v890_v59, %v928_v5  ;;  %v942_v48 = vsel %vm658_vm8, %v936_v46, 0.0 }
 0x37f   :  { %v939_v63 = vsel %vm658_vm8, %v929_v2, 0.0  ;;  %943 = vadd.xlane.f32.xlu0 %v942_v48 }
 0x380   :  { %940 = vadd.xlane.f32.xlu1 %v939_v63 }
 0x40c   :  { %v944_v53 = vpop.xlane.xlu0 %943 }
 0x40d   :  { %v941_v52 = vpop.xlane.xlu1 %940 }
 0x40e   :  { %1427 = vrcp.f32 %v941_v52 }
 0x40f   :  { %1429 = vrcp.f32 %v944_v53 }
 0x418   :  { %v1428_v14 = vpop.eup %1427 }
 0x419   :  { %v1430_v51 = vpop.eup %1429  ;;  %v956_v26 = vrot.slane %v1428_v14, %v1585_v10  ;;  %v952_v49 = vrot.slane %v1428_v14, %v1588_v11  ;;  %v960_v58 = vrot.slane %v1428_v14, %v1603_v15 }
 0x41a   :  { %v988_v13 = vrot.slane %v1430_v51, %v1585_v10  ;;  %v984_v0 = vrot.slane %v1430_v51, %v1588_v11  ;;  %v992_v1 = vrot.slane %v1430_v51, %v1603_v15  ;;  %v996_v10 = vrot.slane %v1430_v51, %v1624_v23 }
 0x41b   :  { %v1030_v50 = vmul.f32 %v1858_v44, %v956_v26  ;;  %v1029_v22 = vmul.f32 %v1856_v43, %v952_v49  ;;  %v1031_v43 = vmul.f32 %v1886_v3, %v960_v58  ;;  %v964_v11 = vrot.slane %v1428_v14, %v1624_v23 }
 0x41c   :  { %v1038_v9 = vmul.f32 %v1876_v57, %v988_v13  ;;  %v1037_v61 = vmul.f32 %v1874_v54, %v984_v0  ;;  %v1039_v44 = vmul.f32 %v1888_v4, %v992_v1  ;;  %v1040_v57 = vmul.f32 %v1896_v31, %v996_v10 }
 0x41d   :  { %1052 = vperm.xlu1 %1393, %v1030_v50   ;;  %1047 = vperm.xlu0 %1394, %v1029_v22   ;;  %v1032_v54 = vmul.f32 %v1894_v8, %v964_v11  ;;  %v1000_v32 = vrot.slane %v1430_v51, %v1643_v30  ;;  %v968_v15 = vrot.slane %v1428_v14, %v1643_v30 }
 0x41e   :  { %v1004_v7 = vrot.slane %v1430_v51, %v1654_v37  ;;  %v972_v23 = vrot.slane %v1428_v14, %v1654_v37  ;;  %v1008_v62 = vrot.slane %v1430_v51, %v1665_v42  ;;  %v976_v30 = vrot.slane %v1428_v14, %v1665_v42 }
 0x41f   :  { %v1041_v4 = vmul.f32 %v1902_v27, %v1000_v32  ;;  %v1033_v3 = vmul.f32 %v1900_v21, %v968_v15  ;;  %v1012_v16 = vrot.slane %v1430_v51, %v1734_v35  ;;  %v980_v37 = vrot.slane %v1428_v14, %v1734_v35  ;;  %v1433_v15 = vld [vmem:[#allocation2 + $0x20] sm:$0xff] }
 0x420   :  { %v1042_v31 = vmul.f32 %v1908_v60, %v1004_v7  ;;  %v1034_v8 = vmul.f32 %v1906_v36, %v972_v23  ;;  %v1043_v27 = vmul.f32 %v1914_v28, %v1008_v62  ;;  %v1035_v21 = vmul.f32 %v1912_v12, %v976_v30 }
 0x421   :  { %1092 = vperm.xlu0 %1394, %v1038_v9   ;;  %1087 = vperm.xlu1 %1393, %v1037_v61   ;;  %v1044_v60 = vmul.f32 %v1920_v29, %v1012_v16  ;;  %v1036_v36 = vmul.f32 %v1918_v47, %v980_v37 }
 0x425   :  { %1097 = vperm.xlu0 %1394, %v1039_v44   ;;  %1057 = vperm.xlu1 %1393, %v1031_v43  }
 0x429   :  { %1102 = vperm.xlu0 %1394, %v1040_v57   ;;  %1062 = vperm.xlu1 %1393, %v1032_v54  }
 0x42d   :  { %1107 = vperm.xlu0 %1394, %v1041_v4   ;;  %1067 = vperm.xlu1 %1393, %v1033_v3  }
 0x431   :  { %1112 = vperm.xlu0 %1394, %v1042_v31   ;;  %1072 = vperm.xlu1 %1393, %v1034_v8  }
 0x435   :  { %1117 = vperm.xlu0 %1394, %v1043_v27   ;;  %1077 = vperm.xlu1 %1393, %v1035_v21  }
 0x439   :  { %1122 = vperm.xlu0 %1394, %v1044_v60   ;;  %1082 = vperm.xlu1 %1393, %v1036_v36  }
 0x49c   :  { %v1053_v38 = vpop.permute.xlu1 %1052  ;;  %v1048_v42 = vpop.permute.xlu0 %1047 }
 0x49d   :  { %v1126_v33 = vmul.f32 %v1053_v38, %v1607_v17  ;;  %v1125_v28 = vmul.f32 %v1431_v34, %v1048_v42  ;;  %v1435_v34 = vld [vmem:[#allocation2 + $0x28] sm:$0xff] }
 0x49f   :  { %v1148_v12 = vsel %vm76_vm0, %v1126_v33, 0.0  ;;  %v1141_v56 = vsel %vm76_vm0, %v1125_v28, 0.0 }
 0x4a0   :  { %v1149_v39 = vrot.slane %v1148_v12, 4  ;;  %v1142_v35 = vrot.slane %v1141_v56, 4  ;;  %v1088_v40 = vpop.permute.xlu1 %1087  ;;  %v1093_v59 = vpop.permute.xlu0 %1092 }
 0x4a1   :  { %v1133_v29 = vmul.f32 %v1432_v55, %v1088_v40  ;;  %v1134_v47 = vmul.f32 %v1093_v59, %v1609_v18 }
 0x4a2   :  { %v1150_v41 = vadd.f32 %v1149_v39, %v1148_v12  ;;  %v1143_v6 = vadd.f32 %v1142_v35, %v1141_v56  ;;  %v1436_v12 = vld [vmem:[#allocation2 + $0x68] sm:$0xff] }
 0x4a3   :  { %v1197_v5 = vsel %vm76_vm0, %v1133_v29, 0.0  ;;  %v1204_v17 = vsel %vm76_vm0, %v1134_v47, 0.0 }
 0x4a4   :  { %v1151_v2 = vrot.slane %v1150_v41, 2  ;;  %v1198_v45 = vrot.slane %v1197_v5, 4  ;;  %v1205_v63 = vrot.slane %v1204_v17, 4  ;;  %v1058_v46 = vpop.permute.xlu1 %1057  ;;  %v1098_v48 = vpop.permute.xlu0 %1097  ;;  %v1144_v52 = vrot.slane %v1143_v6, 2 }
 0x4a5   :  { %v1127_v53 = vmul.f32 %v1058_v46, %v1611_v19  ;;  %v1135_v51 = vmul.f32 %v1098_v48, %v1613_v20 }
 0x4a6   :  { %v1199_v14 = vadd.f32 %v1198_v45, %v1197_v5  ;;  %v1206_v26 = vadd.f32 %v1205_v63, %v1204_v17  ;;  %v1152_v49 = vadd.f32 %v1151_v2, %v1150_v41  ;;  %v1145_v22 = vadd.f32 %v1144_v52, %v1143_v6 }
 0x4a7   :  { %v1155_v13 = vsel %vm76_vm0, %v1127_v53, 0.0  ;;  %v1211_v1 = vsel %vm76_vm0, %v1135_v51, 0.0  ;;  %v1437_v53 = vld [vmem:[#allocation2 + $0x30] sm:$0xff] }
 0x4a8   :  { %v1063_v18 = vpop.permute.xlu1 %1062  ;;  %v1103_v50 = vpop.permute.xlu0 %1102  ;;  %v1200_v61 = vrot.slane %v1199_v14, 2  ;;  %v1207_v58 = vrot.slane %v1206_v26, 2  ;;  %v1153_v20 = vrot.slane %v1152_v49, 1  ;;  %v1156_v43 = vrot.slane %v1155_v13, 4  ;;  %v1438_v51 = vld [vmem:[#allocation2 + $0x70] sm:$0xff] }
 0x4a9   :  { %v1128_v0 = vmul.f32 %v1063_v18, %v1628_v24  ;;  %v1136_v9 = vmul.f32 %v1103_v50, %v1632_v25  ;;  %v1146_v57 = vrot.slane %v1145_v22, 1  ;;  %v1212_v54 = vrot.slane %v1211_v1, 4  ;;  %v1434_v25 = vld [vmem:[#allocation2 + $0x60] sm:$0xff] }
 0x4aa   :  { %v1201_v24 = vadd.f32 %v1200_v61, %v1199_v14  ;;  %v1208_v23 = vadd.f32 %v1207_v58, %v1206_v26  ;;  %v1154_v8 = vadd.f32 %v1153_v20, %v1152_v49  ;;  %v1157_v62 = vadd.f32 %v1156_v43, %v1155_v13 }
 0x4ab   :  { %v1162_v19 = vsel %vm76_vm0, %v1128_v0, 0.0  ;;  %v1218_v44 = vsel %vm76_vm0, %v1136_v9, 0.0  ;;  %v1147_v37 = vadd.f32 %v1146_v57, %v1145_v22  ;;  %v1213_v60 = vadd.f32 %v1212_v54, %v1211_v1  ;;  %v1439_v57 = vld [vmem:[#allocation2 + $0x38] sm:$0xff] }
 0x4ac   :  { %v1068_v10 = vpop.permute.xlu1 %1067  ;;  %v1108_v11 = vpop.permute.xlu0 %1107  ;;  %v1163_v32 = vrot.slane %v1162_v19, 4  ;;  %v1219_v3 = vrot.slane %v1218_v44, 4  ;;  %v1202_v42 = vrot.slane %v1201_v24, 1  ;;  %v1209_v39 = vrot.slane %v1208_v23, 1 }
 0x4ad   :  { %v1129_v4 = vmul.f32 %v1433_v15, %v1068_v10  ;;  %v1137_v7 = vmul.f32 %v1434_v25, %v1108_v11  ;;  %v1158_v40 = vrot.slane %v1157_v62, 2  ;;  %v2007_v6 = vsel %vm635_vm1, %v1154_v8, %v1147_v37 }
 0x4ae   :  { %v1164_v36 = vadd.f32 %v1163_v32, %v1162_v19  ;;  %v1220_v33 = vadd.f32 %v1219_v3, %v1218_v44  ;;  %v1214_v5 = vrot.slane %v1213_v60, 2  ;;  %v2009_v2 = vadd.f32 %v1202_v42, %v1201_v24  ;;  %v1440_v32 = vld [vmem:[#allocation2 + $0x78] sm:$0xff] }
 0x4af   :  { %v1169_v31 = vsel %vm76_vm0, %v1129_v4, 0.0  ;;  %v1225_v27 = vsel %vm76_vm0, %v1137_v7, 0.0  ;;  %v1210_v48 = vadd.f32 %v1209_v39, %v1208_v23  ;;  %v1159_v49 = vadd.f32 %v1158_v40, %v1157_v62 }
 0x4b0   :  { %v1170_v30 = vrot.slane %v1169_v31, 4  ;;  %v1073_v21 = vpop.permute.xlu1 %1072  ;;  %v1113_v16 = vpop.permute.xlu0 %1112  ;;  %v1226_v38 = vrot.slane %v1225_v27, 4  ;;  %v1165_v17 = vrot.slane %v1164_v36, 2  ;;  %v1221_v45 = vrot.slane %v1220_v33, 2 }
 0x4b1   :  { %v1130_v28 = vmul.f32 %v1435_v34, %v1073_v21  ;;  %v1138_v56 = vmul.f32 %v1436_v12, %v1113_v16  ;;  %v1215_v9 = vadd.f32 %v1214_v5, %v1213_v60  ;;  %v1160_v4 = vrot.slane %v1159_v49, 1 }
 0x4b2   :  { %v1171_v35 = vadd.f32 %v1170_v30, %v1169_v31  ;;  %v1227_v59 = vadd.f32 %v1226_v38, %v1225_v27  ;;  %v1166_v61 = vadd.f32 %v1165_v17, %v1164_v36  ;;  %v1222_v19 = vadd.f32 %v1221_v45, %v1220_v33 }
 0x4b3   :  { %v1176_v55 = vsel %vm76_vm0, %v1130_v28, 0.0  ;;  %v1232_v29 = vsel %vm76_vm0, %v1138_v56, 0.0  ;;  %v1216_v62 = vrot.slane %v1215_v9, 1  ;;  %v1161_v28 = vadd.f32 %v1160_v4, %v1159_v49 }
 0x4b4   :  { %v1078_v47 = vpop.permute.xlu1 %1077  ;;  %v1118_v41 = vpop.permute.xlu0 %1117  ;;  %v1177_v63 = vrot.slane %v1176_v55, 4  ;;  %v1233_v46 = vrot.slane %v1232_v29, 4  ;;  %v1172_v52 = vrot.slane %v1171_v35, 2  ;;  %v1228_v18 = vrot.slane %v1227_v59, 2 }
 0x4b5   :  { %v1131_v14 = vmul.f32 %v1437_v53, %v1078_v47  ;;  %v1139_v26 = vmul.f32 %v1438_v51, %v1118_v41  ;;  %v1167_v30 = vrot.slane %v1166_v61, 1  ;;  %v1223_v16 = vrot.slane %v1222_v19, 1 }
 0x4b6   :  { %v1178_v50 = vadd.f32 %v1177_v63, %v1176_v55  ;;  %v1234_v22 = vadd.f32 %v1233_v46, %v1232_v29  ;;  %v1173_v10 = vadd.f32 %v1172_v52, %v1171_v35  ;;  %v1229_v24 = vadd.f32 %v1228_v18, %v1227_v59 }
 0x4b7   :  { %v1183_v1 = vsel %vm76_vm0, %v1131_v14, 0.0  ;;  %v1239_v58 = vsel %vm76_vm0, %v1139_v26, 0.0  ;;  %v1217_v35 = vadd.f32 %v1216_v62, %v1215_v9  ;;  %v1168_v40 = vadd.f32 %v1167_v30, %v1166_v61 }
 0x4b8   :  { %v1083_v13 = vpop.permute.xlu1 %1082  ;;  %v1123_v0 = vpop.permute.xlu0 %1122  ;;  %v1179_v44 = vrot.slane %v1178_v50, 2  ;;  %v1235_v20 = vrot.slane %v1234_v22, 2  ;;  %v1184_v43 = vrot.slane %v1183_v1, 4  ;;  %v1240_v11 = vrot.slane %v1239_v58, 4 }
 0x4b9   :  { %v1132_v54 = vmul.f32 %v1439_v57, %v1083_v13  ;;  %v1140_v15 = vmul.f32 %v1440_v32, %v1123_v0  ;;  %v1174_v37 = vrot.slane %v1173_v10, 1  ;;  %v1230_v38 = vrot.slane %v1229_v24, 1 }
 0x4ba   :  { %v1180_v3 = vadd.f32 %v1179_v44, %v1178_v50  ;;  %v1185_v25 = vadd.f32 %v1184_v43, %v1183_v1  ;;  %v1236_v7 = vadd.f32 %v1235_v20, %v1234_v22  ;;  %v1241_v23 = vadd.f32 %v1240_v11, %v1239_v58 }
 0x4bb   :  { %v1190_v31 = vsel %vm76_vm0, %v1132_v54, 0.0  ;;  %v1246_v8 = vsel %vm76_vm0, %v1140_v15, 0.0  ;;  %v1224_v29 = vadd.f32 %v1223_v16, %v1222_v19  ;;  %v1175_v47 = vadd.f32 %v1174_v37, %v1173_v10 }
 0x4bc   :  { %v1186_v27 = vrot.slane %v1185_v25, 2  ;;  %v1191_v21 = vrot.slane %v1190_v31, 4  ;;  %v1242_v60 = vrot.slane %v1241_v23, 2  ;;  %v1247_v36 = vrot.slane %v1246_v8, 4 }
 0x4bd   :  { %v1181_v42 = vrot.slane %v1180_v3, 1  ;;  %v1237_v12 = vrot.slane %v1236_v7, 1  ;;  %v1276_v17 = vsel %vm635_vm1, %v1210_v48, %v2009_v2  ;;  %v1231_v45 = vadd.f32 %v1230_v38, %v1229_v24 }
 0x4be   :  { %v1187_v33 = vadd.f32 %v1186_v27, %v1185_v25  ;;  %v1192_v34 = vadd.f32 %v1191_v21, %v1190_v31  ;;  %v1243_v56 = vadd.f32 %v1242_v60, %v1241_v23  ;;  %v1248_v39 = vadd.f32 %v1247_v36, %v1246_v8 }
 0x4bf   :  { %v1182_v63 = vadd.f32 %v1181_v42, %v1180_v3  ;;  %v1270_v52 = vsel %vm637_vm2, %v1161_v28, %v2007_v6  ;;  %v1238_v53 = vadd.f32 %v1237_v12, %v1236_v7  ;;  %v1277_v26 = vsel %vm637_vm2, %v1217_v35, %v1276_v17 }
 0x4c0   :  { %v1188_v59 = vrot.slane %v1187_v33, 1  ;;  %v1193_v55 = vrot.slane %v1192_v34, 2  ;;  %v1244_v41 = vrot.slane %v1243_v56, 1  ;;  %v1249_v5 = vrot.slane %v1248_v39, 2 }
 0x4c1   :  { %v1271_v49 = vsel %vm639_vm3, %v1168_v40, %v1270_v52  ;;  %v1278_v22 = vsel %vm639_vm3, %v1224_v29, %v1277_v26 }
 0x4c2   :  { %v1194_v46 = vadd.f32 %v1193_v55, %v1192_v34  ;;  %v1189_v14 = vadd.f32 %v1188_v59, %v1187_v33  ;;  %v1250_v51 = vadd.f32 %v1249_v5, %v1248_v39  ;;  %v1245_v18 = vadd.f32 %v1244_v41, %v1243_v56 }
 0x4c3   :  { %v1272_v13 = vsel %vm641_vm4, %v1175_v47, %v1271_v49  ;;  %v1279_v48 = vsel %vm641_vm4, %v1231_v45, %v1278_v22 }
 0x4c4   :  { %v1195_v50 = vrot.slane %v1194_v46, 1  ;;  %v1251_v2 = vrot.slane %v1250_v51, 1  ;;  %v1273_v6 = vsel %vm643_vm5, %v1182_v63, %v1272_v13  ;;  %v1280_v1 = vsel %vm643_vm5, %v1238_v53, %v1279_v48 }
 0x4c5   :  { %v1274_v61 = vsel %vm645_vm6, %v1189_v14, %v1273_v6  ;;  %v1281_v19 = vsel %vm645_vm6, %v1245_v18, %v1280_v1 }
 0x4c6   :  { %v1196_v0 = vadd.f32 %v1195_v50, %v1194_v46  ;;  %v1252_v9 = vadd.f32 %v1251_v2, %v1250_v51 }
 0x4c8   :  { %v1275_v58 = vsel %vm647_vm7, %v1196_v0, %v1274_v61  ;;  %v1282_v44 = vsel %vm647_vm7, %v1252_v9, %v1281_v19 }
 0x4c9   :  { %1285 = vst.msk [vmem:[#allocation7] sm:$0xff] %vm76_vm0, %v1275_v58  ;;  %1286 = vst.msk [vmem:[#allocation7 + $0x8] sm:$0xff] %vm76_vm0, %v1282_v44 }
 0x4ca   :  { %1496 = shalt.err (!%p1493_p6)
}
 0x4cb   :  { %s1497_s27 = scalar_lea.hbm %s2052_s5, 256 }
 0x4cc   :  { %p1498_p7 = scmp.ne.s32.totalorder %s2052_s5, %s1497_s27  ;;  %p1501_p8 = scmp.lt.u32.totalorder %s1497_s27, %s2052_s5 }
 0x4ce   :  { %p1503_p9 = pnand %p1501_p8, %p1498_p7 }
 0x4d0   :  { %1506 = shalt.err (!%p1503_p9)
}
 0x4d1   :  { %1298 = dma.vmem_to_hbm [thread:$0]  %s1293_s4, 256, %s2052_s5, [#allocation4], %s1514_s28, %s1514_s28, %s1515_s29  }
 0x4d2   :  { %1511 = dma.done.wait [#allocation4], 256  }
 0x4d3   :  { %1512 = vsyncadd [#allocation4], 4294967040 }
 0x4d4   :  { %1302 = vsyncpa [#allocation3], 1 }
 0x4d5   :  { %1303 = vsyncpa [#allocation6], 1 }
 0x4d6   :  { %1304 = vsyncpa [#allocation4], 1 }

</bundles_post_ra>
